<compile_context>
chip_gen: v7x
topology: tpu7x:2x2x1
jax: 0.10.0
libtpu: 0.0.40
codegen_flags: <defaults>
</compile_context>

<pallas_src>
import functools

import jax
import jax.numpy as jnp
from jax.experimental import pallas as pl
from jax.experimental.pallas import tpu as pltpu

# ----------------------------- hyper parameters -----------------------------
B = 2        # batch
N = 8        # num_nodes
T = 16       # Tin
TOUT = 8     # outputT
DMODEL = 32  # dmodel
HOPS = 2     # args.hops

LANES = 128      # packed-parameter slab width / decode output width
ADJ_ROWS = 16    # adjacency section padded to a full bf16 sublane tile


# --------------------------------- kernel -----------------------------------
def _gcn_atte_kernel(acts_ref, par_ref, o_ref, *, batch, n, t_in, t_out, d,
                     hops):
    """Whole batch in one shot (no grid).

    acts_ref : (B*N, 2*T + Tout) bf16  [vx | tx | ty], batch-major rows b*N + n
    par_ref  : (152, 128)        bf16  packed [adj; w_in; w_g_k; w_out; w_t; w_ty]
    o_ref    : (B*N, 128)        f32   decode result in cols [0, Tout), rest 0
    """
    f32 = jnp.float32
    bf16 = jnp.bfloat16

    # static, 16-row-aligned section offsets inside the parameter slab
    r_in = ADJ_ROWS                      # w_in rows
    r_g = r_in + t_in                    # w_g[k] rows
    r_dec_h = r_g + hops * d             # w_out rows (padded to 128 cols)
    r_dec_t = r_dec_h + d                # [w_t ; w_ty] rows (padded to 128 cols)
    r_end = r_dec_t + t_in + t_out

    adj = par_ref[0:n, 0:n]                        # (N, N)          bf16
    vx = acts_ref[:, 0:t_in]                       # (B*N, T)        bf16
    txty = acts_ref[:, t_in:]                      # (B*N, T + Tout) bf16

    # input embedding: (B*N, T) @ (T, D) -> (B*N, D), f32 accumulation
    h = jnp.dot(vx, par_ref[r_in:r_in + t_in, 0:d],
                preferred_element_type=f32)

    # hops-order graph convolution with ReLU (statically unrolled).
    for k in range(hops):
        w_k = par_ref[r_g + k * d: r_g + (k + 1) * d, 0:d]           # (D, D)
        hw = jnp.dot(h.astype(bf16), w_k, preferred_element_type=f32)  # (B*N, D)
        # adjacency applied per batch (rows b*N .. (b+1)*N); B unrolled, no kron
        h = jnp.concatenate(
            [jnp.dot(adj, hw[bi * n:(bi + 1) * n, :].astype(bf16),
                     preferred_element_type=f32)
             for bi in range(batch)],
            axis=0)                                                   # (B*N, D)
        h = jnp.maximum(h, 0.0)

    # fused decode without lane-axis concat:
    #   out = h @ w_out_pad + [tx | ty] @ [w_t ; w_ty]_pad   -> (B*N, 128)
    out = jnp.dot(h.astype(bf16), par_ref[r_dec_h:r_dec_t, :],
                  preferred_element_type=f32)
    out = out + jnp.dot(txty, par_ref[r_dec_t:r_end, :],
                        preferred_element_type=f32)
    o_ref[...] = out.astype(o_ref.dtype)


# ------------------------- one-time parameter packing ------------------------
def prepare_params(params):
    """Pack every parameter into one bf16 slab. Call ONCE, outside the hot path.

    Slab layout (rows, all sections 16-row aligned, 128 lanes wide):
      [  0,  16) adj   in cols [0, N)
      [ 16,  32) w_in  in cols [0, D)
      [ 32,  96) w_g_k in cols [0, D)            (HOPS * D rows)
      [ 96, 128) w_out in cols [0, Tout), zero-padded to 128 (lane-dense decode)
      [128, 152) [w_t ; w_ty] likewise padded to 128 columns
    """
    def pad_to(w, rows, cols=LANES):
        return jnp.pad(w, ((0, rows - w.shape[0]), (0, cols - w.shape[1])))

    pieces = [pad_to(params["adj"], ADJ_ROWS),
              pad_to(params["w_in"], T)]
    pieces += [pad_to(params["w_g"][k], DMODEL) for k in range(HOPS)]
    pieces += [pad_to(params["w_out"], DMODEL),
               pad_to(params["w_t"], T),
               pad_to(params["w_ty"], TOUT)]
    slab = jnp.concatenate(pieces, axis=0)
    expected_rows = ADJ_ROWS + T + HOPS * DMODEL + DMODEL + T + TOUT
    assert slab.shape == (expected_rows, LANES), slab.shape
    return slab.astype(jnp.bfloat16)


# -------------------------------- forward ------------------------------------
@jax.jit
def mixnet_forward(X, Y, packed_params, teacher_forcing_ratio=0.0):
    """Reproduces mixNet.forward: slice channels, run the GcnAtteNet stand-in."""
    del teacher_forcing_ratio  # inference: unused (see TODO above)

    # exact slicing semantics of mixNet.forward
    vx = X[..., 0]     # (B, N, T)
    tx = X[..., 1]     # (B, N, T)
    ty = Y[..., 1]     # (B, N, Tout)

    # single activation slab, batch-major rows: (B*N, 2*T + Tout)
    acts = jnp.concatenate([vx, tx, ty], axis=-1)
    acts = acts.reshape(B * N, 2 * T + TOUT).astype(jnp.bfloat16)

    kernel = functools.partial(_gcn_atte_kernel, batch=B, n=N, t_in=T,
                               t_out=TOUT, d=DMODEL, hops=HOPS)
    vmem = pl.BlockSpec(memory_space=pltpu.MemorySpace.VMEM)

    out_pad = pl.pallas_call(
        kernel,
        out_shape=jax.ShapeDtypeStruct((B * N, LANES), jnp.float32),
        in_specs=[vmem, vmem],
        out_specs=vmem,
    )(acts, packed_params)

    # drop the lane padding, restore (B, N, Tout)
    return out_pad[:, :TOUT].reshape(B, N, TOUT)


def init_params(key):
    ks = jax.random.split(key, 6)
    # row-normalized adjacency (deterministic, softmax of random logits)
    logits = jax.random.normal(ks[0], (N, N), jnp.float32)
    adj = jax.nn.softmax(logits, axis=-1)
    scale = 0.1
    return {
        "adj":   adj,
        "w_in":  scale * jax.random.normal(ks[1], (T, DMODEL), jnp.float32),
        "w_g":   scale * jax.random.normal(ks[2], (HOPS, DMODEL, DMODEL), jnp.float32),
        "w_out": scale * jax.random.normal(ks[3], (DMODEL, TOUT), jnp.float32),
        "w_t":   scale * jax.random.normal(ks[4], (T, TOUT), jnp.float32),
        "w_ty":  scale * jax.random.normal(ks[5], (TOUT, TOUT), jnp.float32),
    }


if __name__ == "__main__":
    key = jax.random.PRNGKey(0)
    kx, ky, kp = jax.random.split(key, 3)

    X = jax.random.normal(kx, (B, N, T, 2), jnp.float32)
    Y = jax.random.normal(ky, (B, N, TOUT, 2), jnp.float32)
    params = init_params(kp)

    # parameter packing happens exactly once, off the per-call path
    packed = jax.block_until_ready(prepare_params(params))

    out = mixnet_forward(X, Y, packed, teacher_forcing_ratio=0.0)
    out = jax.block_until_ready(out)
    assert out.shape == (B, N, TOUT), out.shape
    assert bool(jnp.all(jnp.isfinite(out)))
    print("KERNEL_OK")
</pallas_src>

<mosaic_0001>
module attributes {stable_mosaic.version = 11 : i64} {
  func.func @_gcn_atte_kernel(%arg0: memref<16x40xbf16, #tpu.memory_space<vmem>>, %arg1: memref<152x128xbf16, #tpu.memory_space<vmem>>, %arg2: memref<16x128xf32, #tpu.memory_space<vmem>>) attributes {dimension_semantics = [], scalar_prefetch = 0 : i64, scratch_operands = 0 : i64, tpu.core_type = #tpu.core_type<tc>} {
    %c0 = arith.constant 0 : index
    %c0_0 = arith.constant 0 : index
    %0 = vector.load %arg1[%c0, %c0_0] : memref<152x128xbf16, #tpu.memory_space<vmem>>, vector<8x8xbf16>
    %c0_1 = arith.constant 0 : index
    %c0_2 = arith.constant 0 : index
    %1 = vector.load %arg0[%c0_1, %c0_2] : memref<16x40xbf16, #tpu.memory_space<vmem>>, vector<16x16xbf16>
    %c0_3 = arith.constant 0 : index
    %c16 = arith.constant 16 : index
    %2 = vector.load %arg0[%c0_3, %c16] : memref<16x40xbf16, #tpu.memory_space<vmem>>, vector<16x24xbf16>
    %c16_4 = arith.constant 16 : index
    %c0_5 = arith.constant 0 : index
    %3 = vector.load %arg1[%c16_4, %c0_5] : memref<152x128xbf16, #tpu.memory_space<vmem>>, vector<16x32xbf16>
    %cst = arith.constant dense<0.000000e+00> : vector<16x32xf32>
    %4 = tpu.matmul %1, %3, %cst {dimension_numbers = #tpu.dot_dimension_numbers<[1], [0], [0], [1], [0, 0, 1, 1], [], []>} : vector<16x16xbf16>, vector<16x32xbf16>, vector<16x32xf32> -> vector<16x32xf32>
    %c32 = arith.constant 32 : index
    %c0_6 = arith.constant 0 : index
    %5 = vector.load %arg1[%c32, %c0_6] : memref<152x128xbf16, #tpu.memory_space<vmem>>, vector<32x32xbf16>
    %6 = arith.truncf %4 : vector<16x32xf32> to vector<16x32xbf16>
    %cst_7 = arith.constant dense<0.000000e+00> : vector<16x32xf32>
    %7 = tpu.matmul %6, %5, %cst_7 {dimension_numbers = #tpu.dot_dimension_numbers<[1], [0], [0], [1], [0, 0, 1, 1], [], []>} : vector<16x32xbf16>, vector<32x32xbf16>, vector<16x32xf32> -> vector<16x32xf32>
    %8 = vector.extract_strided_slice %7 {offsets = [0, 0], sizes = [8, 32], strides = [1, 1]} : vector<16x32xf32> to vector<8x32xf32>
    %9 = arith.truncf %8 : vector<8x32xf32> to vector<8x32xbf16>
    %cst_8 = arith.constant dense<0.000000e+00> : vector<8x32xf32>
    %10 = tpu.matmul %0, %9, %cst_8 {dimension_numbers = #tpu.dot_dimension_numbers<[1], [0], [0], [1], [0, 0, 1, 1], [], []>} : vector<8x8xbf16>, vector<8x32xbf16>, vector<8x32xf32> -> vector<8x32xf32>
    %11 = vector.extract_strided_slice %7 {offsets = [8, 0], sizes = [8, 32], strides = [1, 1]} : vector<16x32xf32> to vector<8x32xf32>
    %12 = arith.truncf %11 : vector<8x32xf32> to vector<8x32xbf16>
    %cst_9 = arith.constant dense<0.000000e+00> : vector<8x32xf32>
    %13 = tpu.matmul %0, %12, %cst_9 {dimension_numbers = #tpu.dot_dimension_numbers<[1], [0], [0], [1], [0, 0, 1, 1], [], []>} : vector<8x8xbf16>, vector<8x32xbf16>, vector<8x32xf32> -> vector<8x32xf32>
    %14 = tpu.concatenate %10, %13 in 0 : vector<8x32xf32>, vector<8x32xf32> -> vector<16x32xf32>
    %cst_10 = arith.constant 0.000000e+00 : f32
    %15 = vector.broadcast %cst_10 : f32 to vector<16x32xf32>
    %16 = arith.maximumf %14, %15 : vector<16x32xf32>
    %c64 = arith.constant 64 : index
    %c0_11 = arith.constant 0 : index
    %17 = vector.load %arg1[%c64, %c0_11] : memref<152x128xbf16, #tpu.memory_space<vmem>>, vector<32x32xbf16>
    %18 = arith.truncf %16 : vector<16x32xf32> to vector<16x32xbf16>
    %cst_12 = arith.constant dense<0.000000e+00> : vector<16x32xf32>
    %19 = tpu.matmul %18, %17, %cst_12 {dimension_numbers = #tpu.dot_dimension_numbers<[1], [0], [0], [1], [0, 0, 1, 1], [], []>} : vector<16x32xbf16>, vector<32x32xbf16>, vector<16x32xf32> -> vector<16x32xf32>
    %20 = vector.extract_strided_slice %19 {offsets = [0, 0], sizes = [8, 32], strides = [1, 1]} : vector<16x32xf32> to vector<8x32xf32>
    %21 = arith.truncf %20 : vector<8x32xf32> to vector<8x32xbf16>
    %cst_13 = arith.constant dense<0.000000e+00> : vector<8x32xf32>
    %22 = tpu.matmul %0, %21, %cst_13 {dimension_numbers = #tpu.dot_dimension_numbers<[1], [0], [0], [1], [0, 0, 1, 1], [], []>} : vector<8x8xbf16>, vector<8x32xbf16>, vector<8x32xf32> -> vector<8x32xf32>
    %23 = vector.extract_strided_slice %19 {offsets = [8, 0], sizes = [8, 32], strides = [1, 1]} : vector<16x32xf32> to vector<8x32xf32>
    %24 = arith.truncf %23 : vector<8x32xf32> to vector<8x32xbf16>
    %cst_14 = arith.constant dense<0.000000e+00> : vector<8x32xf32>
    %25 = tpu.matmul %0, %24, %cst_14 {dimension_numbers = #tpu.dot_dimension_numbers<[1], [0], [0], [1], [0, 0, 1, 1], [], []>} : vector<8x8xbf16>, vector<8x32xbf16>, vector<8x32xf32> -> vector<8x32xf32>
    %26 = tpu.concatenate %22, %25 in 0 : vector<8x32xf32>, vector<8x32xf32> -> vector<16x32xf32>
    %cst_15 = arith.constant 0.000000e+00 : f32
    %27 = vector.broadcast %cst_15 : f32 to vector<16x32xf32>
    %28 = arith.maximumf %26, %27 : vector<16x32xf32>
    %29 = arith.truncf %28 : vector<16x32xf32> to vector<16x32xbf16>
    %c96 = arith.constant 96 : index
    %c0_16 = arith.constant 0 : index
    %30 = vector.load %arg1[%c96, %c0_16] : memref<152x128xbf16, #tpu.memory_space<vmem>>, vector<32x128xbf16>
    %cst_17 = arith.constant dense<0.000000e+00> : vector<16x128xf32>
    %31 = tpu.matmul %29, %30, %cst_17 {dimension_numbers = #tpu.dot_dimension_numbers<[1], [0], [0], [1], [0, 0, 1, 1], [], []>} : vector<16x32xbf16>, vector<32x128xbf16>, vector<16x128xf32> -> vector<16x128xf32>
    %c128 = arith.constant 128 : index
    %c0_18 = arith.constant 0 : index
    %32 = vector.load %arg1[%c128, %c0_18] : memref<152x128xbf16, #tpu.memory_space<vmem>>, vector<24x128xbf16>
    %cst_19 = arith.constant dense<0.000000e+00> : vector<16x128xf32>
    %33 = tpu.matmul %2, %32, %cst_19 {dimension_numbers = #tpu.dot_dimension_numbers<[1], [0], [0], [1], [0, 0, 1, 1], [], []>} : vector<16x24xbf16>, vector<24x128xbf16>, vector<16x128xf32> -> vector<16x128xf32>
    %34 = arith.addf %31, %33 : vector<16x128xf32>
    %c0_20 = arith.constant 0 : index
    %c0_21 = arith.constant 0 : index
    %35 = vector.load %arg2[%c0_20, %c0_21] : memref<16x128xf32, #tpu.memory_space<vmem>>, vector<16x128xf32>
    tpu.vector_store %arg2[%c0_20, %c0_21], %34 {strides = array<i32>} : memref<16x128xf32, #tpu.memory_space<vmem>>, vector<16x128xf32>,
    return
  }
}

</mosaic_0001>

<bundles_post_ra>
// kernel: mixnet_forward.1
= control target key start
LH: loop header
LB: loop body
LE: loop exit
PB: predicated region body
PF: predicated region fallthrough
CT: control target
= control target key end

     0   :  { %v630_v0 = vmov 0.0   ;;  %vm631_vm0 = vmmov 0   ;;  %vm28_vm1 = vcmask 130048   ;;  %vm90_vm2 = vcmask 261120   ;;  %s632_s22 = smov 112   ;;  %s730_s1 = inlined_call_operand.vmem [shape: bf16[152,128], index: 1, kind: input, shape index: {}]   ;;  %s731_s0 = inlined_call_operand.vmem [shape: bf16[16,40], index: 0, kind: input, shape index: {}]   ;;  %s732_s2 = inlined_call_operand.vmem [shape: f32[16,128], index: 2, kind: output, shape index: {}]  }
   0x1   :  { %551 = vmatprep.subr.bf16.mxu0 %v630_v0  ;;  %v620_v1 = vld [vmem:[%s730_s1 + $0x8] sm:$0xff]   ;;  %553 = vmatprep.mubr.msk.bf16.mxu0 %vm631_vm0, %v630_v0  ;;  %v621_v2 = vld [vmem:[%s731_s0] sm:$0xff]   ;;  %v622_v3 = vld [vmem:[%s730_s1 + $0x10] sm:$0xff]   ;;  %vm140_vm3 = vcmask 1043456   ;;  %vm136_vm4 = vcmask 64512   ;;  %vm400_vm5 = vcmask 195584  }
   0x2   :  { %571 = vmatprep.subr.bf16.mxu1 %v630_v0  ;;  %573 = vmatprep.mubr.msk.bf16.mxu1 %vm631_vm0, %v630_v0  ;;  %v623_v4 = vld [vmem:[%s730_s1 + $0x18] sm:$0xff]   ;;  %v12_v17 = vld [vmem:[%s730_s1] sm:$0xf]  ;;  %v625_v20 = vld [vmem:[%s730_s1 + $0x28] sm:$0xff]  }
   0x3   :  { %552 = vmatpush3.bf16.msra.mxu0 %v620_v1  ;;  %v624_v19 = vld [vmem:[%s730_s1 + $0x20] sm:$0xff]   ;;  %389 = vrot.lane.b32.xlu0 %v621_v2, %s632_s22  ;;  %v627_v41 = vld [vmem:[%s730_s1 + $0x48] ss:$0 sps:$4 sm:$0xff]   ;;  %v628_v44 = vld [vmem:[%s730_s1 + $0x30] sm:$0xff]  }
   0x4   :  { %557 = vmatprep.subr.bf16.mxu0 %v630_v0  ;;  %v626_v39 = vld [vmem:[%s730_s1 + $0x40] sm:$0xff]   ;;  %v405_v42 = vsel %vm140_vm3, %v627_v41, 0  ;;  %v629_v45 = vld [vmem:[%s730_s1 + $0x38] sm:$0xff]  }
   0x6   :  { %554 = vmatmul.mubr.msk.bf16.vlgmr.msra.gmra.mrb[0].mxu0 %vm28_vm1, %v621_v2 }
   0x7   :  { %558 = vmatpush3.bf16.msra.mxu0 %v622_v3  ;;  %561 = vmatprep.mubr.msk.bf16.mxu0 %vm631_vm0, %v630_v0 }
   0x8   :  { %559 = vmatprep.subr.bf16.mxu0 %v630_v0 }
   0xb   :  { %560 = vmatpush3.bf16.msra.mxu0 %v623_v4 }
   0xc   :  { %565 = vmatprep.subr.bf16.mxu0 %v630_v0 }
  0x75   :  { %v390_v43 = vpop.permute.xlu0 %389 }
  0xd9   :  { %v66_v5 = vpop.f32.mrb[0].mxu0 }
  0xda   :  { %v555_v6 = vpop.f32.mrb[1].mxu0 }
  0xdb   :  { %v69_v7 = vpop.f32.mrb[2].mxu0 }
  0xdc   :  { %v77_v8 = vpack.c.bf16 %v69_v7, %v66_v5  ;;  %v556_v9 = vpop.f32.mrb[3].mxu0 }
  0xde   :  { %562 = vmatmul.mubr.msk.bf16.vlgmr.msra.gmra.mrb[4].mxu0 %vm90_vm2, %v77_v8 }
  0xdf   :  { %567 = vmatprep.mubr.msk.bf16.mxu0 %vm631_vm0, %v630_v0 }
 0x1b1   :  { %v128_v10 = vpop.f32.mrb[4].mxu0 }
 0x1b2   :  { %v135_v11 = vpack.c.bf16 %v128_v10, %v128_v10  ;;  %v563_v12 = vpop.f32.mrb[5].mxu0 }
 0x1b3   :  { %v131_v13 = vpop.f32.mrb[6].mxu0 }
 0x1b4   :  { %v142_v14 = vsel %vm140_vm3, %v135_v11, 0  ;;  %v184_v15 = vpack.c.bf16 %v131_v13, %v131_v13  ;;  %v564_v16 = vpop.f32.mrb[7].mxu0 }
 0x1b5   :  { %566 = vmatpush3.bf16.msra.mxu0 %v142_v14 }
 0x1b6   :  { %v186_v18 = vsel %vm140_vm3, %v184_v15, 0  ;;  %577 = vmatprep.subr.bf16.mxu0 %v630_v0 }
 0x1b7   :  { %572 = vmatpush3.bf16.msra.mxu1 %v186_v18 }
 0x1b8   :  { %568 = vmatmul.mubr.msk.bf16.vlgmr.msra.gmra.mrb[8].mxu0 %vm136_vm4, %v12_v17  ;;  %585 = vmatprep.subr.bf16.mxu1 %v630_v0 }
 0x1b9   :  { %581 = vmatprep.mubr.msk.bf16.mxu0 %vm631_vm0, %v630_v0  ;;  %578 = vmatpush3.bf16.msra.mxu0 %v624_v19 }
 0x1ba   :  { %574 = vmatmul.mubr.msk.bf16.vlgmr.msra.gmra.mrb[0].mxu1 %vm136_vm4, %v12_v17  ;;  %579 = vmatprep.subr.bf16.mxu0 %v630_v0 }
 0x1bb   :  { %587 = vmatprep.mubr.msk.bf16.mxu1 %vm631_vm0, %v630_v0 }
 0x1bd   :  { %580 = vmatpush3.bf16.msra.mxu0 %v625_v20 }
 0x1be   :  { %591 = vmatprep.subr.bf16.mxu0 %v630_v0 }
 0x28b   :  { %v178_v21 = vpop.f32.mrb[8].mxu0 }
 0x28c   :  { %v228_v22 = vmax.f32 %v178_v21, 0.0  ;;  %v569_v23 = vpop.f32.mrb[9].mxu0 }
 0x28d   :  { %v181_v24 = vpop.f32.mrb[10].mxu0  ;;  %v222_v25 = vpop.f32.mrb[0].mxu1 }
 0x28e   :  { %v229_v26 = vmax.f32 %v222_v25, 0.0  ;;  %v570_v27 = vpop.f32.mrb[11].mxu0  ;;  %v575_v28 = vpop.f32.mrb[1].mxu1 }
 0x28f   :  { %v225_v29 = vpop.f32.mrb[2].mxu1 }
 0x290   :  { %v234_v30 = vpack.c.bf16 %v229_v26, %v228_v22  ;;  %v576_v31 = vpop.f32.mrb[3].mxu1 }
 0x292   :  { %582 = vmatmul.mubr.msk.bf16.vlgmr.msra.gmra.mrb[12].mxu0 %vm90_vm2, %v234_v30 }
 0x293   :  { %593 = vmatprep.mubr.msk.bf16.mxu0 %vm631_vm0, %v630_v0 }
 0x365   :  { %v284_v32 = vpop.f32.mrb[12].mxu0 }
 0x366   :  { %v291_v33 = vpack.c.bf16 %v284_v32, %v284_v32  ;;  %v583_v34 = vpop.f32.mrb[13].mxu0 }
 0x367   :  { %v287_v35 = vpop.f32.mrb[14].mxu0 }
 0x368   :  { %v293_v36 = vsel %vm140_vm3, %v291_v33, 0  ;;  %v335_v37 = vpack.c.bf16 %v287_v35, %v287_v35  ;;  %v584_v38 = vpop.f32.mrb[15].mxu0 }
 0x369   :  { %586 = vmatpush3.bf16.msra.mxu1 %v293_v36 }
 0x36a   :  { %v337_v40 = vsel %vm140_vm3, %v335_v37, 0  ;;  %597 = vmatprep.subr.bf16.mxu1 %v630_v0 }
 0x36b   :  { %592 = vmatpush3.bf16.msra.mxu0 %v337_v40 }
 0x36c   :  { %588 = vmatmul.mubr.msk.bf16.vlgmr.msra.gmra.mrb[4].mxu1 %vm136_vm4, %v12_v17 }
 0x36d   :  { %598 = vmatpush3.bf16.msra.mxu1 %v626_v39  ;;  %601 = vmatprep.mubr.msk.bf16.mxu1 %vm631_vm0, %v630_v0 }
 0x36e   :  { %594 = vmatmul.mubr.msk.bf16.vlgmr.msra.gmra.mrb[16].mxu0 %vm136_vm4, %v12_v17  ;;  %599 = vmatprep.subr.bf16.mxu1 %v630_v0 }
 0x371   :  { %600 = vmatpush3.bf16.msra.mxu1 %v405_v42 }
 0x372   :  { %605 = vmatprep.subr.bf16.mxu1 %v630_v0 }
 0x374   :  { %602 = vmatmul.mubr.msk.bf16.vlgmr.msra.gmra.mrb[8].mxu1 %vm400_vm5, %v390_v43 }
 0x375   :  { %606 = vmatpush3.bf16.msra.mxu1 %v628_v44  ;;  %609 = vmatprep.mubr.msk.bf16.mxu1 %vm631_vm0, %v630_v0 }
 0x376   :  { %607 = vmatprep.subr.bf16.mxu1 %v630_v0 }
 0x379   :  { %608 = vmatpush3.bf16.msra.mxu1 %v629_v45 }
 0x43f   :  { %v329_v46 = vpop.f32.mrb[4].mxu1 }
 0x440   :  { %v379_v47 = vmax.f32 %v329_v46, 0.0  ;;  %v589_v48 = vpop.f32.mrb[5].mxu1 }
 0x441   :  { %v373_v49 = vpop.f32.mrb[16].mxu0  ;;  %v332_v50 = vpop.f32.mrb[6].mxu1 }
 0x442   :  { %v380_v51 = vmax.f32 %v373_v49, 0.0  ;;  %v595_v52 = vpop.f32.mrb[17].mxu0  ;;  %v590_v53 = vpop.f32.mrb[7].mxu1 }
 0x443   :  { %v376_v54 = vpop.f32.mrb[18].mxu0 }
 0x444   :  { %v381_v55 = vpack.c.bf16 %v380_v51, %v379_v47  ;;  %v596_v56 = vpop.f32.mrb[19].mxu0 }
 0x446   :  { %610 = vmatmul.mubr.msk.bf16.vlgmr.msra.gmra.mrb[8].mxu1 %vm90_vm2, %v381_v55 }
 0x519   :  { %v497_v57 = vpop.f32.mrb[8].mxu1 }
 0x51a   :  { %504 = vst [vmem:[%s732_s2] sm:$0xff] %v497_v57  ;;  %v611_v58 = vpop.f32.mrb[9].mxu1 }
 0x51b   :  { %v500_v59 = vpop.f32.mrb[10].mxu1 }
 0x51c   :  { %505 = vst [vmem:[%s732_s2 + $0x8] sm:$0xff] %v500_v59  ;;  %v612_v60 = vpop.f32.mrb[11].mxu1 }

</bundles_post_ra>
